<compile_context>
chip_gen: v7x
topology: tpu7x:2x2x1
jax: 0.10.0
libtpu: 0.0.40
codegen_flags: <defaults>
</compile_context>

<pallas_src>
import dataclasses

import jax
import jax.numpy as jnp
from jax.experimental import pallas as pl
from jax.experimental.pallas import tpu as pltpu


@dataclasses.dataclass
class SamplerOutput:
    """Mirrors the PyTorch SamplerOutput (weight + bias of one adapter)."""
    weight: jax.Array = None
    bias: jax.Array = None


def _round_up(x, m):
    return ((x + m - 1) // m) * m


def _as_f32(x):
    return x if x.dtype == jnp.float32 else x.astype(jnp.float32)


def _hypernet_kernel(emb_ref, wg_ref, bg_ref, wb_ref, bb_ref,
                     w_out_ref, b_out_ref):
    emb = emb_ref[...]                                          # (1, K)

    # Generated-weight chunk: emb · Wg_tile^T -> (1, block_n).
    # dot_general contracts the K axis of BOTH operands, so the (N, K)
    # torch-layout weight tile is used untransposed.
    w_chunk = jax.lax.dot_general(
        emb, wg_ref[...],
        dimension_numbers=(((1,), (1,)), ((), ())),
        preferred_element_type=jnp.float32)
    w_out_ref[...] = w_chunk + bg_ref[...]

    # Generated bias: emb · Wb^T -> (1, input_dim).  Tiny (input_dim*K MACs),
    # recomputed each grid step so every output block is written exactly once
    # (safe under "parallel" / megacore sharding of the grid axis).
    b_vec = jax.lax.dot_general(
        emb, wb_ref[...],
        dimension_numbers=(((1,), (1,)), ((), ())),
        preferred_element_type=jnp.float32)
    b_out_ref[0] = b_vec + bb_ref[...]


def adapter_layers_hypernet_forward(embeddings, params, input_dim, output_dim,
                                    *, block_n=None):
    """params: dict of torch nn.Linear-layout parameters:
         weight_gen_w: (input_dim*output_dim, proj_dim)
         weight_gen_b: (input_dim*output_dim,)
         bias_gen_w:   (input_dim, proj_dim)
         bias_gen_b:   (input_dim,)
       embeddings: (proj_dim,) or (1, proj_dim) float32.
    """
    emb = _as_f32(embeddings).reshape(1, -1)
    k = emb.shape[1]
    n = input_dim * output_dim

    wg = _as_f32(params["weight_gen_w"])
    bg = _as_f32(params["weight_gen_b"])
    wb = _as_f32(params["bias_gen_w"])
    bb = _as_f32(params["bias_gen_b"])
    assert wg.shape == (n, k) and bg.shape == (n,)
    assert wb.shape == (input_dim, k) and bb.shape == (input_dim,)

    if block_n is None:
        # ~4 MiB of Wg per tile; double-buffered this stays far below the VMEM
        # limits of every generation (v5e 16 MiB scoped default, v7x 64 MiB).
        budget = 4 * 1024 * 1024
        block_n = max(128, (budget // (k * 4)) // 128 * 128)
    block_n = min(block_n, _round_up(n, 128))       # multiple of 128, <= padded N
    n_pad = _round_up(n, block_n)
    grid_n = pl.cdiv(n_pad, block_n)

    if n_pad != n:
        wg = jnp.pad(wg, ((0, n_pad - n), (0, 0)))
        bg = jnp.pad(bg, (0, n_pad - n))
    bg2 = bg.reshape(1, n_pad)
    bb2 = bb.reshape(1, input_dim)

    weight_flat, bias_rows = pl.pallas_call(
        _hypernet_kernel,
        out_shape=(
            jax.ShapeDtypeStruct((1, n_pad), jnp.float32),
            jax.ShapeDtypeStruct((grid_n, 1, input_dim), jnp.float32),
        ),
        grid_spec=pltpu.PrefetchScalarGridSpec(
            num_scalar_prefetch=0,
            grid=(grid_n,),
            in_specs=[
                pl.BlockSpec((1, k), lambda i: (0, 0)),            # embedding (VMEM-resident)
                pl.BlockSpec((block_n, k), lambda i: (i, 0)),      # Wg tile (streamed)
                pl.BlockSpec((1, block_n), lambda i: (0, i)),      # bg tile
                pl.BlockSpec((input_dim, k), lambda i: (0, 0)),    # Wb (resident)
                pl.BlockSpec((1, input_dim), lambda i: (0, 0)),    # bb (resident)
            ],
            out_specs=[
                pl.BlockSpec((1, block_n), lambda i: (0, i)),          # lane-dense weight slab
                pl.BlockSpec((1, 1, input_dim), lambda i: (i, 0, 0)),  # per-step bias row
            ],
        ),
        compiler_params=pltpu.CompilerParams(
            dimension_semantics=("parallel",),      # shard grid across TCs on v7x
            vmem_limit_bytes=32 * 1024 * 1024,      # explicit headroom on all gens
        ),
    )(emb, wg, bg2, wb, bb2)

    weight = weight_flat[0, :n].reshape(input_dim, output_dim)
    bias = bias_rows[0, 0]
    return SamplerOutput(weight=weight, bias=bias)


def _reference(embeddings, params, input_dim, output_dim):
    emb = embeddings.reshape(1, -1).astype(jnp.float32)
    w = (emb @ params["weight_gen_w"].T + params["weight_gen_b"]
         ).reshape(input_dim, output_dim)
    b = (emb @ params["bias_gen_w"].T + params["bias_gen_b"]).reshape(-1)
    return w, b


if __name__ == "__main__":
    proj_dim = 32  # config.projected_task_embedding_dim
    key = jax.random.PRNGKey(0)

    cases = [
        # (input_dim, output_dim, block_n)
        (32, 16, 128),   # N = 512 -> 4-step tiled "parallel" grid
        (24, 20, None),  # N = 480 -> exercises padding of the generated-weight axis
    ]

    for input_dim, output_dim, block_n in cases:
        key, *ks = jax.random.split(key, 6)
        n = input_dim * output_dim
        embeddings = jax.random.normal(ks[0], (proj_dim,), dtype=jnp.float32)
        params = {
            # torch nn.Linear layouts; small random values (adapter-paper init
            # uses std=0.01 weights / zero biases — nonzero biases here so the
            # bias-add path is actually checked).
            "weight_gen_w": 0.01 * jax.random.normal(ks[1], (n, proj_dim), dtype=jnp.float32),
            "weight_gen_b": 0.01 * jax.random.normal(ks[2], (n,), dtype=jnp.float32),
            "bias_gen_w": 0.01 * jax.random.normal(ks[3], (input_dim, proj_dim), dtype=jnp.float32),
            "bias_gen_b": 0.01 * jax.random.normal(ks[4], (input_dim,), dtype=jnp.float32),
        }

        out = adapter_layers_hypernet_forward(
            embeddings, params, input_dim, output_dim, block_n=block_n)
        jax.block_until_ready(out.weight)
        jax.block_until_ready(out.bias)

        w_ref, b_ref = _reference(embeddings, params, input_dim, output_dim)
        assert out.weight.shape == (input_dim, output_dim)
        assert out.bias.shape == (input_dim,)
        assert jnp.allclose(out.weight, w_ref, atol=1e-3, rtol=1e-3), \
            float(jnp.max(jnp.abs(out.weight - w_ref)))
        assert jnp.allclose(out.bias, b_ref, atol=1e-3, rtol=1e-3), \
            float(jnp.max(jnp.abs(out.bias - b_ref)))

    print("KERNEL_OK")
</pallas_src>

<mosaic_0001>
module attributes {stable_mosaic.version = 11 : i64} {
  func.func @_hypernet_kernel(%arg0: i32, %arg1: memref<1x32xf32, #tpu.memory_space<vmem>>, %arg2: memref<128x32xf32, #tpu.memory_space<vmem>>, %arg3: memref<1x128xf32, #tpu.memory_space<vmem>>, %arg4: memref<32x32xf32, #tpu.memory_space<vmem>>, %arg5: memref<1x32xf32, #tpu.memory_space<vmem>>, %arg6: memref<1x128xf32, #tpu.memory_space<vmem>>, %arg7: memref<1x1x32xf32, #tpu.memory_space<vmem>>) attributes {dimension_semantics = [#tpu.dimension_semantics<parallel>], iteration_bounds = array<i64: 4>, scalar_prefetch = 0 : i64, scratch_operands = 0 : i64, tpu.core_type = #tpu.core_type<tc>, window_params = [{pipeline_mode = #tpu.pipeline_mode<synchronous>, transform_indices = @transform_0, window_bounds = array<i64: 1, 32>}, {transform_indices = @transform_1, window_bounds = array<i64: 128, 32>}, {transform_indices = @transform_2, window_bounds = array<i64: 1, 128>}, {pipeline_mode = #tpu.pipeline_mode<synchronous>, transform_indices = @transform_3, window_bounds = array<i64: 32, 32>}, {pipeline_mode = #tpu.pipeline_mode<synchronous>, transform_indices = @transform_4, window_bounds = array<i64: 1, 32>}, {transform_indices = @transform_5, window_bounds = array<i64: 1, 128>}, {transform_indices = @transform_6, window_bounds = array<i64: 1, 1, 32>}]} {
    %c0 = arith.constant 0 : index
    %c0_0 = arith.constant 0 : index
    %0 = vector.load %arg1[%c0, %c0_0] : memref<1x32xf32, #tpu.memory_space<vmem>>, vector<1x32xf32>
    %c0_1 = arith.constant 0 : index
    %c0_2 = arith.constant 0 : index
    %1 = vector.load %arg2[%c0_1, %c0_2] : memref<128x32xf32, #tpu.memory_space<vmem>>, vector<128x32xf32>
    %cst = arith.constant dense<0.000000e+00> : vector<1x128xf32>
    %2 = tpu.matmul %0, %1, %cst {dimension_numbers = #tpu.dot_dimension_numbers<[1], [1], [0], [0], [0, 0, 1, 0], [], []>} : vector<1x32xf32>, vector<128x32xf32>, vector<1x128xf32> -> vector<1x128xf32>
    %c0_3 = arith.constant 0 : index
    %c0_4 = arith.constant 0 : index
    %3 = vector.load %arg3[%c0_3, %c0_4] : memref<1x128xf32, #tpu.memory_space<vmem>>, vector<1x128xf32>
    %4 = arith.addf %2, %3 : vector<1x128xf32>
    %c0_5 = arith.constant 0 : index
    %c0_6 = arith.constant 0 : index
    %5 = vector.load %arg6[%c0_5, %c0_6] : memref<1x128xf32, #tpu.memory_space<vmem>>, vector<1x128xf32>
    tpu.vector_store %arg6[%c0_5, %c0_6], %4 {strides = array<i32>} : memref<1x128xf32, #tpu.memory_space<vmem>>, vector<1x128xf32>,
    %c0_7 = arith.constant 0 : index
    %c0_8 = arith.constant 0 : index
    %6 = vector.load %arg4[%c0_7, %c0_8] : memref<32x32xf32, #tpu.memory_space<vmem>>, vector<32x32xf32>
    %cst_9 = arith.constant dense<0.000000e+00> : vector<1x32xf32>
    %7 = tpu.matmul %0, %6, %cst_9 {dimension_numbers = #tpu.dot_dimension_numbers<[1], [1], [0], [0], [0, 0, 1, 0], [], []>} : vector<1x32xf32>, vector<32x32xf32>, vector<1x32xf32> -> vector<1x32xf32>
    %c0_10 = arith.constant 0 : index
    %c0_11 = arith.constant 0 : index
    %8 = vector.load %arg5[%c0_10, %c0_11] : memref<1x32xf32, #tpu.memory_space<vmem>>, vector<1x32xf32>
    %9 = arith.addf %7, %8 : vector<1x32xf32>
    %c0_12 = arith.constant 0 : index
    %c0_13 = arith.constant 0 : index
    %c0_14 = arith.constant 0 : index
    %10 = vector.load %arg7[%c0_12, %c0_13, %c0_14] : memref<1x1x32xf32, #tpu.memory_space<vmem>>, vector<1x1x32xf32>
    %11 = vector.shape_cast %10 : vector<1x1x32xf32> to vector<1x32xf32>
    %12 = vector.shape_cast %9 : vector<1x32xf32> to vector<1x1x32xf32>
    tpu.vector_store %arg7[%c0_12, %c0_13, %c0_14], %12 {strides = array<i32>} : memref<1x1x32xf32, #tpu.memory_space<vmem>>, vector<1x1x32xf32>,
    return
  }
  func.func @transform_0(%arg0: i32) -> (i32, i32) {
    %c0_i32 = arith.constant 0 : i32
    %c0_i32_0 = arith.constant 0 : i32
    %c0_i32_1 = arith.constant 0 : i32
    return %c0_i32, %c0_i32_0 : i32, i32
  }
  func.func @transform_1(%arg0: i32) -> (i32, i32) {
    %c0_i32 = arith.constant 0 : i32
    %c0_i32_0 = arith.constant 0 : i32
    return %arg0, %c0_i32 : i32, i32
  }
  func.func @transform_2(%arg0: i32) -> (i32, i32) {
    %c0_i32 = arith.constant 0 : i32
    %c0_i32_0 = arith.constant 0 : i32
    return %c0_i32, %arg0 : i32, i32
  }
  func.func @transform_3(%arg0: i32) -> (i32, i32) {
    %c0_i32 = arith.constant 0 : i32
    %c0_i32_0 = arith.constant 0 : i32
    %c0_i32_1 = arith.constant 0 : i32
    return %c0_i32, %c0_i32_0 : i32, i32
  }
  func.func @transform_4(%arg0: i32) -> (i32, i32) {
    %c0_i32 = arith.constant 0 : i32
    %c0_i32_0 = arith.constant 0 : i32
    %c0_i32_1 = arith.constant 0 : i32
    return %c0_i32, %c0_i32_0 : i32, i32
  }
  func.func @transform_5(%arg0: i32) -> (i32, i32) {
    %c0_i32 = arith.constant 0 : i32
    %c0_i32_0 = arith.constant 0 : i32
    return %c0_i32, %arg0 : i32, i32
  }
  func.func @transform_6(%arg0: i32) -> (i32, i32, i32) {
    %c0_i32 = arith.constant 0 : i32
    %c0_i32_0 = arith.constant 0 : i32
    %c0_i32_1 = arith.constant 0 : i32
    return %arg0, %c0_i32, %c0_i32_0 : i32, i32, i32
  }
}

</mosaic_0001>

<bundles_post_ra>
// kernel: tpu_custom_call.1
= control target key start
LH: loop header
LB: loop body
LE: loop exit
PB: predicated region body
PF: predicated region fallthrough
CT: control target
= control target key end

     0   :  { %12 = vsyncpa [#allocation3], 0  ;;  %s1157_s0 = inlined_call_operand.vmem [shape: f32[1,32], index: 0, kind: input, shape index: {}]   ;;  %s1158_s1 = inlined_call_operand.vmem [shape: f32[512,32], index: 1, kind: input, shape index: {}]   ;;  %s1159_s2 = inlined_call_operand.vmem [shape: f32[1,512], index: 2, kind: input, shape index: {}]   ;;  %s1160_s3 = inlined_call_operand.vmem [shape: f32[32,32], index: 3, kind: input, shape index: {}]   ;;  %s1161_s4 = inlined_call_operand.vmem [shape: f32[1,32], index: 4, kind: input, shape index: {}]   ;;  %s1162_s5 = inlined_call_operand.hbm [shape: f32[1,512], index: 5, kind: output, shape index: {0}]   ;;  %s1163_s6 = inlined_call_operand.hbm [shape: f32[4,1,32], index: 6, kind: output, shape index: {1}]  }
   0x1   :  { %14 = vsyncpa [#allocation3 + $0x1], 0 }
   0x2   :  { %15 = vsyncpa [#allocation5], 0 }
   0x3   :  { %17 = vsyncpa [#allocation5 + $0x1], 0  ;;  %s950_s21 = smov 0   ;;  %s952_s22 = smov 0  }
   0x4   :  { %s954_s23 = smov 0   ;;  %s956_s24 = smov 0  }
   0x5 LB: > { %s971_s25 = sadd.s32 4294967295, %s908_s24   ;;  %s627_s26 = sadd.s32 4294967294, %s908_s24   ;;  %s908_s24 = sphi %s956_s24, %s1171_s24   ;;  %s904_s23 = sphi %s954_s23, %s1170_s23   ;;  %s900_s22 = sphi %s952_s22, %s1169_s22   ;;  %s896_s21 = sphi %s950_s21, %s1168_s21  }
   0x6   : > { %s975_s27 = sadd.s32 1, %s908_s24   ;;  %s145_s28 = sadd.s32 1, %s904_s23 }
   0x7   : > { %s142_s29 = ssub.s32 %s908_s24, %s975_s27  ;;  %p155_p0 = scmp.ne.s32.totalorder %s904_s23, %s900_s22 }
   0x8   : > { %p143_p1 = scmp.eq.s32.totalorder %s142_s29, 0  ;;  %p156_p2 = scmp.eq.s32.totalorder %s971_s25, 3 }
   0x9   : > { %p161_p3 = scmp.ne.s32.totalorder %s900_s22, %s896_s21  ;;  %p162_p4 = scmp.eq.s32.totalorder %s627_s26, 3 }
   0xa   : > { %s986_s30 = scalar_select %p143_p1, %s904_s23, %s145_s28  }
   0xb   : > { %p988_p5 = por %p156_p2, %p155_p0  ;;  %p992_p6 = por %p162_p4, %p161_p3 }
   0xc   : > { %p630_p7 = scmp.ge.s32.totalorder %s908_s24, 1  ;;  %p230_p8 = scmp.lt.s32.totalorder %s908_s24, 5 }
   0xe   : > { %p231_p9 = pnand %p630_p7, %p230_p8 }
   0xf   : > { %s999_s9 = sshll.u32 (!%p231_p9), %s971_s25, 4  ;;  %vm293_vm0 = vcmask (!%p231_p9), 261120   ;;  %v416_v0 = vld [vmem:[%s1160_s3] sm:$0xff] (!%p231_p9)  ;;  %v417_v1 = vld [vmem:[%s1160_s3 + $0x8] sm:$0xff] (!%p231_p9)  ;;  %v910_v2 = vmov (!%p231_p9), 0.0|0.0   ;;  %vm911_vm2 = vmmov (!%p231_p9), 0  }
  0x10   : > { %234 = sbr.rel (%p231_p9) target bundleno = 321 (0x141), region = 40  ;;  %727 = vmatprep.subr.bf16.mxu0 (!%p231_p9), %v910_v2  ;;  %p267_p10 = scmp.lt.s32.totalorder (!%p231_p9), %s999_s9, 63  ;;  %759 = vmatprep.subr.bf16.mxu1 (!%p231_p9), %v910_v2  ;;  %v760_v3 = vpack.c.bf16 (!%p231_p9), %v417_v1, %v416_v0  ;;  %vm1010_vm1 = vmpackc.low (!%p231_p9), %vm293_vm0, %vm293_vm0  ;;  %v912_v5 = vmov (!%p231_p9), 0.0   ;;  %v418_v6 = vld [vmem:[%s1160_s3 + $0x10] sm:$0xff] (!%p231_p9)  ;;  %v419_v7 = vld [vmem:[%s1160_s3 + $0x18] sm:$0xff] (!%p231_p9)  ;;  %vm503_vm3 = vcmask (!%p231_p9), 253952  }
  0x11   : > { %724 = vmatprep.mubr.msk.f32.mxu1 (!%p231_p9), %vm911_vm2, %v912_v5  ;;  %713 = vmatprep.mubr.msk.f32.mxu0 (!%p231_p9), %vm911_vm2, %v912_v5  ;;  %v764_v10 = vpack.c.bf16 (!%p231_p9), %v419_v7, %v418_v6  ;;  %v275_v15 = vld [vmem:[%s1157_s0] sm:$0x1] (!%p231_p9)  ;;  %s1068_s11 = sand.u32 (!%p231_p9), 1, %s900_s22   ;;  %s1078_s18 = scalar_lea.hbm (!%p231_p9), %s1163_s6, %s999_s9 }
  0x12   : > { %762 = vmatpush3.bf16.xpose.msk.msra.mxu1 (!%p231_p9), %vm1010_vm1, %v760_v3  ;;  %v420_v34 = vld [vmem:[%s1161_s4] sm:$0x1] (!%p231_p9)  ;;  %s913_s26 = smov (!%p231_p9), [#allocation4]  }
  0x13   : > { %763 = vmatprep.subr.bf16.mxu1 (!%p231_p9), %v910_v2 }
  0x17   : > { %s268_s14 = scalar_select %p267_p10, %s999_s9, 63 }
  0x19   : > { %s632_s19 = sshll.u32 %s268_s14, 3  ;;  %s265_s14 = scalar_lea.vmem [#allocation4], %s1068_s11 }
  0x1a   : > { %s1026_s28 = scalar_lea.vmem %s1158_s1, %s632_s19  ;;  %766 = vmatpush3.bf16.xpose.msk.msra.mxu1 %vm1010_vm1, %v764_v10  ;;  %s535_s15 = sshll.u32 %s265_s14, 4  ;;  %s1080_s15 = int_to_ptr.vmem [resolvable:$true] %s535_s15 }
  0x1b   : > { %v276_v8 = vld [vmem:[%s1026_s28] sm:$0xff]  ;;  %v277_v9 = vld [vmem:[%s1026_s28 + $0x8] sm:$0xff]  ;;  %v278_v12 = vld [vmem:[%s1026_s28 + $0x10] sm:$0xff]  ;;  %s510_s19 = scalar_lea.sflag [#allocation5], %s1068_s11  ;;  %s814_s20 = scalar_lea.vmem %s1080_s15, 16 }
  0x1c   : > { %v728_v11 = vpack.c.bf16 %v277_v9, %v276_v8  ;;  %v279_v13 = vld [vmem:[%s1026_s28 + $0x18] sm:$0xff]  ;;  %v280_v16 = vld [vmem:[%s1026_s28 + $0x20] sm:$0xff]  ;;  %v281_v17 = vld [vmem:[%s1026_s28 + $0x28] sm:$0xff]  ;;  %p815_p11 = scmp.ne.s32.totalorder %s1080_s15, %s814_s20 }
  0x1d   : > { %v732_v14 = vpack.c.bf16 %v279_v13, %v278_v12  ;;  %v736_v18 = vpack.c.bf16 %v281_v17, %v280_v16  ;;  %v282_v19 = vld [vmem:[%s1026_s28 + $0x30] sm:$0xff]  ;;  %v283_v20 = vld [vmem:[%s1026_s28 + $0x38] sm:$0xff]  ;;  %v284_v22 = vld [vmem:[%s1026_s28 + $0x40] sm:$0xff] }
  0x1e   : > { %730 = vmatpush3.bf16.xpose.msk.msra.mxu0 %vm1010_vm1, %v728_v11  ;;  %v740_v21 = vpack.c.bf16 %v283_v20, %v282_v19  ;;  %v285_v23 = vld [vmem:[%s1026_s28 + $0x48] sm:$0xff]  ;;  %v286_v25 = vld [vmem:[%s1026_s28 + $0x50] sm:$0xff]  ;;  %v287_v26 = vld [vmem:[%s1026_s28 + $0x58] sm:$0xff]  ;;  %p816_p12 = pnand %p815_p11, %p988_p5 }
  0x1f   : > { %731 = vmatprep.subr.bf16.mxu0 %v910_v2  ;;  %v744_v24 = vpack.c.bf16 %v285_v23, %v284_v22  ;;  %v748_v27 = vpack.c.bf16 %v287_v26, %v286_v25  ;;  %v288_v28 = vld [vmem:[%s1026_s28 + $0x60] sm:$0xff]  ;;  %v289_v29 = vld [vmem:[%s1026_s28 + $0x68] sm:$0xff]  ;;  %v290_v31 = vld [vmem:[%s1026_s28 + $0x70] sm:$0xff] }
  0x20   : > { %v752_v30 = vpack.c.bf16 %v289_v29, %v288_v28  ;;  %v291_v32 = vld [vmem:[%s1026_s28 + $0x78] sm:$0xff]  ;;  %p817_p13 = pneg %p816_p12  ;;  %s818_s28 = sshll.u32 %s913_s26, 4  ;;  %s819_s28 = int_to_ptr.vmem [resolvable:$false] %s818_s28 }
  0x21   : > { %725 = vmatmul.mubr.msk.f32.vlgmr.msra.gmra.mrb[0].mxu1 %vm293_vm0, %v275_v15  ;;  %v756_v33 = vpack.c.bf16 %v291_v32, %v290_v31  ;;  %s820_s29 = scalar_lea.vmem %s819_s28, 32  ;;  %p821_p0 = scmp.lt.s32.totalorder %s1080_s15, %s819_s28 }
  0x22   : > { %p822_p1 = scmp.lt.s32.totalorder %s820_s29, %s814_s20 }
  0x24   : > { %p823_p2 = por %p822_p1, %p821_p0 }
  0x26   : > { %734 = vmatpush3.bf16.xpose.msk.msra.mxu0 %vm1010_vm1, %v732_v14  ;;  %p824_p3 = pnand %p823_p2, %p817_p13 }
  0x27   : > { %735 = vmatprep.subr.bf16.mxu0 %v910_v2 }
  0x2e   : > { %738 = vmatpush3.bf16.xpose.msk.msra.mxu0 %vm1010_vm1, %v736_v18 }
  0x2f   : > { %739 = vmatprep.subr.bf16.mxu0 %v910_v2 }
  0x36   : > { %742 = vmatpush3.bf16.xpose.msk.msra.mxu0 %vm1010_vm1, %v740_v21 }
  0x37   : > { %743 = vmatprep.subr.bf16.mxu0 %v910_v2 }
  0x3e   : > { %746 = vmatpush3.bf16.xpose.msk.msra.mxu0 %vm1010_vm1, %v744_v24 }
  0x3f   : > { %747 = vmatprep.subr.bf16.mxu0 %v910_v2 }
  0x46   : > { %750 = vmatpush3.bf16.xpose.msk.msra.mxu0 %vm1010_vm1, %v748_v27 }
  0x47   : > { %751 = vmatprep.subr.bf16.mxu0 %v910_v2 }
  0x4e   : > { %754 = vmatpush3.bf16.xpose.msk.msra.mxu0 %vm1010_vm1, %v752_v30 }
  0x4f   : > { %755 = vmatprep.subr.bf16.mxu0 %v910_v2 }
  0x56   : > { %758 = vmatpush3.bf16.xpose.msk.msra.mxu0 %vm1010_vm1, %v756_v33 }
  0x5d   : > { %714 = vmatmul.mubr.msk.f32.vlgmr.msra.gmra.mrb[0].mxu0 %vm293_vm0, %v275_v15 }
  0xf4   : > { %v499_v35 = vpop.f32.mrb[0].mxu1 }
  0xf5   : > { %v500_v36 = vadd.f32 %v499_v35, %v420_v34  ;;  %v726_v37 = vpop.f32.mrb[1].mxu1 }
  0xf7   : > { %504 = vst.msk [vmem:[%s265_s14] sm:$0x1] %vm503_vm3, %v500_v36 }
  0xf8   : > { %827 = shalt.err (!%p824_p3)
}
  0xf9   : > { %s828_s10 = scalar_lea.hbm %s1078_s18, 16  ;;  %s832_s14 = scalar_lea.hbm %s1163_s6, 64 }
  0xfa   : > { %p829_p4 = scmp.ne.s32.totalorder %s1078_s18, %s828_s10  ;;  %p833_p9 = scmp.lt.u32.totalorder %s1078_s18, %s1163_s6 }
  0xfb   : > { %p834_p10 = scmp.lt.u32.totalorder %s832_s14, %s828_s10  ;;  %p836_p12 = scmp.lt.u32.totalorder %s828_s10, %s1078_s18 }
  0xfc   : > { %p830_p7 = pnand %p829_p4, %p988_p5 }
  0xfd   : > { %p835_p11 = por %p834_p10, %p833_p9 }
  0xfe   : > { %p831_p8 = pneg %p830_p7 }
  0xff   : > { %p837_p13 = por %p836_p12, %p835_p11 }
 0x101   : > { %p838_p0 = pnand %p837_p13, %p831_p8 }
 0x103   : > { %841 = shalt.err (!%p838_p0)
}
 0x104   : > { %768 = dma.vmem_to_hbm [thread:$0]  (%p988_p5), %s1080_s15, 16, %s1078_s18, %s510_s19  }
 0x105   : > { %p272_p1 = scmp.lt.s32.totalorder %s971_s25, 3  ;;  %s259_s29 = scalar_lea.vmem [#allocation2], %s1068_s11 }
 0x106   : > { %s522_s10 = sshll.u32 %s259_s29, 4  ;;  %s1114_s14 = scalar_lea.hbm %s1162_s5, %s999_s9  ;;  %s1116_s10 = int_to_ptr.vmem [resolvable:$true] %s522_s10 }
 0x107   : > { %s1173_s25 = smov (!%p272_p1, %s971_s25), 3  ;;  %s506_s15 = scalar_lea.sflag [#allocation3], %s1068_s11 }
 0x108   : > { %s274_s28 = scalar_lea.vmem %s1159_s2, %s1173_s25  ;;  %s842_s18 = scalar_lea.vmem %s1116_s10, 16 }
 0x109   : > { %v292_v38 = vld [vmem:[%s274_s28] sm:$0x1]  ;;  %p843_p2 = scmp.ne.s32.totalorder %s1116_s10, %s842_s18  ;;  %s914_s25 = smov [#allocation2]  }
 0x10a   : > { %s846_s19 = sshll.u32 %s914_s25, 4  ;;  %s847_s19 = int_to_ptr.vmem [resolvable:$false] %s846_s19 }
 0x10b   : > { %p844_p3 = pnand %p843_p2, %p988_p5  ;;  %s848_s16 = scalar_lea.vmem %s847_s19, 32 }
 0x10c   : > { %p849_p7 = scmp.lt.s32.totalorder %s1116_s10, %s847_s19  ;;  %p850_p8 = scmp.lt.s32.totalorder %s848_s16, %s842_s18 }
 0x10d   : > { %p845_p4 = pneg %p844_p3 }
 0x10e   : > { %p851_p9 = por %p850_p8, %p849_p7 }
 0x110   : > { %p852_p10 = pnand %p851_p9, %p845_p4 }
 0x130   : > { %v411_v39 = vpop.f32.mrb[0].mxu0 }
 0x131   : > { %v412_v40 = vadd.f32 %v411_v39, %v292_v38  ;;  %v715_v41 = vpop.f32.mrb[1].mxu0 }
 0x133   : > { %415 = vst [vmem:[%s259_s29] sm:$0x1] %v412_v40 }
 0x134   : > { %855 = shalt.err (!%p852_p10)
}
 0x135   : > { %s856_s9 = scalar_lea.hbm %s1114_s14, 16  ;;  %s860_s20 = scalar_lea.hbm %s1162_s5, 64 }
 0x136   : > { %p857_p11 = scmp.ne.s32.totalorder %s1114_s14, %s856_s9  ;;  %p861_p0 = scmp.lt.u32.totalorder %s1114_s14, %s1162_s5 }
 0x137   : > { %p862_p1 = scmp.lt.u32.totalorder %s860_s20, %s856_s9  ;;  %p864_p3 = scmp.lt.u32.totalorder %s856_s9, %s1114_s14 }
 0x138   : > { %p858_p12 = pnand %p857_p11, %p988_p5 }
 0x139   : > { %p863_p2 = por %p862_p1, %p861_p0 }
 0x13a   : > { %p859_p13 = pneg %p858_p12 }
 0x13b   : > { %p865_p4 = por %p864_p3, %p863_p2 }
 0x13d   : > { %p866_p7 = pnand %p865_p4, %p859_p13 }
 0x13f   : > { %869 = shalt.err (!%p866_p7)
}
 0x140   : > { %767 = dma.vmem_to_hbm [thread:$0]  (%p988_p5), %s1116_s10, 16, %s1114_s14, %s506_s15  }
 0x141 PF: > { %p778_p8 = scmp.ge.s32.totalorder %s908_s24, 2  ;;  %s547_s29 = sand.u32 1, %s896_s21  }
 0x142   : > { %s548_s12 = scalar_lea.sflag [#allocation3], %s547_s29 }
 0x143   : > { %p772_p9 = pnand %p778_p8, %p992_p6 }
 0x145   : > { %887 = dma.done.wait (!%p772_p9), %s548_s12, 16  }
 0x146   : > { %889 = vsyncadd (!%p772_p9), %s548_s12, 4294967280  ;;  %s556_s13 = scalar_lea.sflag [#allocation5], %s547_s29 }
 0x147   : > { %891 = dma.done.wait (!%p772_p9), %s556_s13, 16  }
 0x148   : > { %893 = vsyncadd (!%p772_p9), %s556_s13, 4294967280  ;;  %p20_p5 = scmp.ge.s32.totalorder %s975_s27, 6   ;;  %s1168_s21 = smov %s900_s22 }
 0x149   : > { %s1169_s22 = smov %s904_s23  ;;  %s1170_s23 = smov %s986_s30 }
 0x14a   : > { %s1171_s24 = smov %s975_s27  ;;  %22 = sbr.rel (!%p20_p5) target bundleno = 5 (0x5), region = 95 }
 0x151   :  { %560 = vsyncpa [#allocation3], 1 }
 0x152   :  { %562 = vsyncpa [#allocation3 + $0x1], 1 }
 0x153   :  { %563 = vsyncpa [#allocation5], 1 }
 0x154   :  { %565 = vsyncpa [#allocation5 + $0x1], 1 }

</bundles_post_ra>
